<compile_context>
chip_gen: v7x
topology: tpu7x:2x2x1
jax: 0.10.0
libtpu: 0.0.40
codegen_flags: <defaults>
</compile_context>

<pallas_src>
import functools

import jax
import jax.numpy as jnp
from jax import lax
from jax.experimental import pallas as pl
from jax.experimental.pallas import tpu as pltpu


def _msa_kernel(xq_ref, xkv_ref, wq_ref, wk_ref, wv_ref, wo_ref, bo_ref, o_ref,
                *, heads):
    # xq_ref : (1, tq, D) bf16 -- query rows for this grid step
    # xkv_ref: (1, N,  D) bf16 -- full sequence (source of K / V)
    # wq/wk/wv_ref: (H, D, d) bf16   (softmax scale pre-folded into wq)
    # wo_ref : (H, d, D) bf16,  bo_ref: (1, D) f32
    xq = xq_ref[0]                                        # (tq, D) bf16
    xkv = xkv_ref[0]                                      # (N, D)  bf16
    tq = xq.shape[0]
    D = wo_ref.shape[2]

    acc = jnp.zeros((tq, D), jnp.float32)
    for h in range(heads):                                # small static loop
        # Per-head projections.  Leading-axis weight slicing is free; this
        # avoids lane-offset activation slices (head_dim < 128) entirely.
        qh = jnp.dot(xq, wq_ref[h], preferred_element_type=jnp.float32)    # (tq, d)
        kh = jnp.dot(xkv, wk_ref[h], preferred_element_type=jnp.float32)   # (N, d)
        vh = jnp.dot(xkv, wv_ref[h], preferred_element_type=jnp.float32)   # (N, d)

        # scores = qh @ kh^T (scale already folded into wq); bf16 MXU, f32 acc.
        dots = lax.dot_general(
            qh.astype(jnp.bfloat16), kh.astype(jnp.bfloat16),
            (((1,), (1,)), ((), ())),
            preferred_element_type=jnp.float32)                            # (tq, N)

        # Numerically stable softmax in f32; reciprocal goes to the EUP slot.
        m = jnp.max(dots, axis=-1, keepdims=True)
        p = jnp.exp(dots - m)
        attn = p * pl.reciprocal(jnp.sum(p, axis=-1, keepdims=True), approx=True)

        oh = jnp.dot(attn.astype(jnp.bfloat16), vh.astype(jnp.bfloat16),
                     preferred_element_type=jnp.float32)                   # (tq, d)

        # Fold this head's output straight through its rows of the output
        # projection -- no concatenate, no lane-offset stores.
        acc = acc + jnp.dot(oh.astype(jnp.bfloat16), wo_ref[h],
                            preferred_element_type=jnp.float32)            # (tq, D)

    # Output-projection bias.  Dropout is identity in eval mode.
    # TODO(synk): training-mode dropout (p=0.1) not implemented (eval semantics).
    o_ref[0] = (acc + bo_ref[0]).astype(o_ref.dtype)


def msa_forward(x, wq_t, wk_t, wv_t, wo_t, bo, *, heads, q_tile=256):
    """x: [B, N, D] float32.  w*_t: [D, D] (already transposed: in x out).
    bo: [D] output-projection bias."""
    B, N, D = x.shape
    assert D % heads == 0, "dim must be divisible by heads"
    d = D // heads
    scale = float(d) ** (-0.5)

    # Fold the softmax scale into the Q projection weight (free at runtime).
    wq_s = wq_t * scale

    # Per-head weight layouts so head slicing in-kernel is a free leading-axis
    # index:  wq/wk/wv: [D, H*d] -> [H, D, d];  wo: [H*d, D] -> [H, d, D].
    def split_out(w):  # columns h*d:(h+1)*d -> head h
        return w.reshape(D, heads, d).transpose(1, 0, 2)

    wq_h = split_out(wq_s).astype(jnp.bfloat16)
    wk_h = split_out(wk_t).astype(jnp.bfloat16)
    wv_h = split_out(wv_t).astype(jnp.bfloat16)
    wo_h = wo_t.reshape(heads, d, D).astype(jnp.bfloat16)
    bo2 = bo.reshape(1, D).astype(jnp.float32)

    # bf16 activations into the kernel (halves x DMA / VMEM); f32 accumulation
    # and f32 output.
    x_bf = x.astype(jnp.bfloat16)

    # Query tiling (scores become (tq, N) instead of (N, N)).
    tq = q_tile if (N % q_tile == 0) else N
    nq = N // tq

    kernel = functools.partial(_msa_kernel, heads=heads)

    return pl.pallas_call(
        kernel,
        out_shape=jax.ShapeDtypeStruct((B, N, D), jnp.float32),
        grid_spec=pltpu.PrefetchScalarGridSpec(
            num_scalar_prefetch=0,
            grid=(B, nq),
            in_specs=[
                pl.BlockSpec((1, tq, D), lambda b, i: (b, i, 0)),      # x (query tile)
                pl.BlockSpec((1, N, D), lambda b, i: (b, 0, 0)),       # x (full, for K/V)
                pl.BlockSpec((heads, D, d), lambda b, i: (0, 0, 0)),   # wq (scaled)
                pl.BlockSpec((heads, D, d), lambda b, i: (0, 0, 0)),   # wk
                pl.BlockSpec((heads, D, d), lambda b, i: (0, 0, 0)),   # wv
                pl.BlockSpec((heads, d, D), lambda b, i: (0, 0, 0)),   # wo
                pl.BlockSpec((1, D), lambda b, i: (0, 0)),             # bias
            ],
            out_specs=pl.BlockSpec((1, tq, D), lambda b, i: (b, i, 0)),
        ),
        compiler_params=pltpu.CompilerParams(
            dimension_semantics=("parallel", "parallel"),
            vmem_limit_bytes=48 * 1024 * 1024),
    )(x_bf, x_bf, wq_h, wk_h, wv_h, wo_h, bo2)


def msa_reference(x, wq_t, wk_t, wv_t, wo_t, bo, *, heads):
    B, N, D = x.shape
    d = D // heads
    scale = float(d) ** (-0.5)
    q = x @ wq_t
    k = x @ wk_t
    v = x @ wv_t

    def split(t):  # b n (h d) -> b h n d
        return t.reshape(B, N, heads, d).transpose(0, 2, 1, 3)

    q, k, v = split(q), split(k), split(v)
    dots = jnp.einsum('bhnd,bhmd->bhnm', q, k) * scale
    attn = jax.nn.softmax(dots, axis=-1)
    out = jnp.einsum('bhnm,bhmd->bhnd', attn, v)
    out = out.transpose(0, 2, 1, 3).reshape(B, N, D)
    return out @ wo_t + bo


if __name__ == "__main__":
    B, N, D, H = 2, 8, 32, 4

    key = jax.random.PRNGKey(0)
    kx, kq, kk, kv, ko, kb = jax.random.split(key, 6)

    x = jax.random.normal(kx, (B, N, D), dtype=jnp.float32)
    # Deterministic "Linear" weights (already transposed to [in, out]).
    std = 1.0 / (D ** 0.5)
    wq_t = jax.random.normal(kq, (D, D), dtype=jnp.float32) * std
    wk_t = jax.random.normal(kk, (D, D), dtype=jnp.float32) * std
    wv_t = jax.random.normal(kv, (D, D), dtype=jnp.float32) * std
    wo_t = jax.random.normal(ko, (D, D), dtype=jnp.float32) * std
    bo = jax.random.normal(kb, (D,), dtype=jnp.float32) * std

    out = msa_forward(x, wq_t, wk_t, wv_t, wo_t, bo, heads=H)
    out = jax.block_until_ready(out)

    ref = msa_reference(x, wq_t, wk_t, wv_t, wo_t, bo, heads=H)
    assert out.shape == (B, N, D)
    # bf16 MXU operands vs. an f32 reference -> tolerance is set for bf16.
    assert jnp.allclose(out, ref, atol=5e-2, rtol=5e-2), "mismatch vs reference"

    print("KERNEL_OK")
</pallas_src>

<mosaic_0001>
module attributes {stable_mosaic.version = 11 : i64} {
  func.func @_msa_kernel(%arg0: i32, %arg1: i32, %arg2: memref<1x8x32xbf16, #tpu.memory_space<vmem>>, %arg3: memref<1x8x32xbf16, #tpu.memory_space<vmem>>, %arg4: memref<4x32x8xbf16, #tpu.memory_space<vmem>>, %arg5: memref<4x32x8xbf16, #tpu.memory_space<vmem>>, %arg6: memref<4x32x8xbf16, #tpu.memory_space<vmem>>, %arg7: memref<4x8x32xbf16, #tpu.memory_space<vmem>>, %arg8: memref<1x32xf32, #tpu.memory_space<vmem>>, %arg9: memref<1x8x32xf32, #tpu.memory_space<vmem>>) attributes {dimension_semantics = [#tpu.dimension_semantics<parallel>, #tpu.dimension_semantics<parallel>], iteration_bounds = array<i64: 2, 1>, scalar_prefetch = 0 : i64, scratch_operands = 0 : i64, tpu.core_type = #tpu.core_type<tc>, window_params = [{transform_indices = @transform_0, window_bounds = array<i64: 1, 8, 32>}, {transform_indices = @transform_1, window_bounds = array<i64: 1, 8, 32>}, {pipeline_mode = #tpu.pipeline_mode<synchronous>, transform_indices = @transform_2, window_bounds = array<i64: 4, 32, 8>}, {pipeline_mode = #tpu.pipeline_mode<synchronous>, transform_indices = @transform_3, window_bounds = array<i64: 4, 32, 8>}, {pipeline_mode = #tpu.pipeline_mode<synchronous>, transform_indices = @transform_4, window_bounds = array<i64: 4, 32, 8>}, {pipeline_mode = #tpu.pipeline_mode<synchronous>, transform_indices = @transform_5, window_bounds = array<i64: 4, 8, 32>}, {pipeline_mode = #tpu.pipeline_mode<synchronous>, transform_indices = @transform_6, window_bounds = array<i64: 1, 32>}, {transform_indices = @transform_7, window_bounds = array<i64: 1, 8, 32>}]} {
    %c0 = arith.constant 0 : index
    %c0_0 = arith.constant 0 : index
    %c0_1 = arith.constant 0 : index
    %0 = vector.load %arg2[%c0, %c0_0, %c0_1] : memref<1x8x32xbf16, #tpu.memory_space<vmem>>, vector<1x8x32xbf16>
    %1 = vector.shape_cast %0 : vector<1x8x32xbf16> to vector<8x32xbf16>
    %c0_2 = arith.constant 0 : index
    %c0_3 = arith.constant 0 : index
    %c0_4 = arith.constant 0 : index
    %2 = vector.load %arg3[%c0_2, %c0_3, %c0_4] : memref<1x8x32xbf16, #tpu.memory_space<vmem>>, vector<1x8x32xbf16>
    %3 = vector.shape_cast %2 : vector<1x8x32xbf16> to vector<8x32xbf16>
    %cst = arith.constant 0.000000e+00 : f32
    %4 = vector.broadcast %cst : f32 to vector<8x32xf32>
    %c0_5 = arith.constant 0 : index
    %c0_6 = arith.constant 0 : index
    %c0_7 = arith.constant 0 : index
    %5 = vector.load %arg4[%c0_5, %c0_6, %c0_7] : memref<4x32x8xbf16, #tpu.memory_space<vmem>>, vector<1x32x8xbf16>
    %6 = vector.shape_cast %5 : vector<1x32x8xbf16> to vector<32x8xbf16>
    %cst_8 = arith.constant dense<0.000000e+00> : vector<8x8xf32>
    %7 = tpu.matmul %1, %6, %cst_8 {dimension_numbers = #tpu.dot_dimension_numbers<[1], [0], [0], [1], [0, 0, 1, 1], [], []>} : vector<8x32xbf16>, vector<32x8xbf16>, vector<8x8xf32> -> vector<8x8xf32>
    %c0_9 = arith.constant 0 : index
    %c0_10 = arith.constant 0 : index
    %c0_11 = arith.constant 0 : index
    %8 = vector.load %arg5[%c0_9, %c0_10, %c0_11] : memref<4x32x8xbf16, #tpu.memory_space<vmem>>, vector<1x32x8xbf16>
    %9 = vector.shape_cast %8 : vector<1x32x8xbf16> to vector<32x8xbf16>
    %cst_12 = arith.constant dense<0.000000e+00> : vector<8x8xf32>
    %10 = tpu.matmul %3, %9, %cst_12 {dimension_numbers = #tpu.dot_dimension_numbers<[1], [0], [0], [1], [0, 0, 1, 1], [], []>} : vector<8x32xbf16>, vector<32x8xbf16>, vector<8x8xf32> -> vector<8x8xf32>
    %c0_13 = arith.constant 0 : index
    %c0_14 = arith.constant 0 : index
    %c0_15 = arith.constant 0 : index
    %11 = vector.load %arg6[%c0_13, %c0_14, %c0_15] : memref<4x32x8xbf16, #tpu.memory_space<vmem>>, vector<1x32x8xbf16>
    %12 = vector.shape_cast %11 : vector<1x32x8xbf16> to vector<32x8xbf16>
    %cst_16 = arith.constant dense<0.000000e+00> : vector<8x8xf32>
    %13 = tpu.matmul %3, %12, %cst_16 {dimension_numbers = #tpu.dot_dimension_numbers<[1], [0], [0], [1], [0, 0, 1, 1], [], []>} : vector<8x32xbf16>, vector<32x8xbf16>, vector<8x8xf32> -> vector<8x8xf32>
    %14 = arith.truncf %7 : vector<8x8xf32> to vector<8x8xbf16>
    %15 = arith.truncf %10 : vector<8x8xf32> to vector<8x8xbf16>
    %cst_17 = arith.constant dense<0.000000e+00> : vector<8x8xf32>
    %16 = tpu.matmul %14, %15, %cst_17 {dimension_numbers = #tpu.dot_dimension_numbers<[1], [1], [0], [0], [0, 0, 1, 0], [], []>} : vector<8x8xbf16>, vector<8x8xbf16>, vector<8x8xf32> -> vector<8x8xf32>
    %cst_18 = arith.constant dense<0xFF800000> : vector<8xf32>
    %17 = vector.multi_reduction <maximumf>, %16, %cst_18 [1] : vector<8x8xf32> to vector<8xf32>
    %18 = vector.shape_cast %17 : vector<8xf32> to vector<8x1xf32>
    %19 = vector.broadcast %18 : vector<8x1xf32> to vector<8x8xf32>
    %20 = arith.subf %16, %19 : vector<8x8xf32>
    %21 = math.exp %20 : vector<8x8xf32>
    %cst_19 = arith.constant dense<0.000000e+00> : vector<8xf32>
    %22 = vector.multi_reduction <add>, %21, %cst_19 [1] : vector<8x8xf32> to vector<8xf32>
    %23 = vector.shape_cast %22 : vector<8xf32> to vector<8x1xf32>
    %24 = tpu.reciprocal %23 {approx = true} : vector<8x1xf32> -> vector<8x1xf32>
    %25 = vector.broadcast %24 : vector<8x1xf32> to vector<8x8xf32>
    %26 = arith.mulf %21, %25 : vector<8x8xf32>
    %27 = arith.truncf %26 : vector<8x8xf32> to vector<8x8xbf16>
    %28 = arith.truncf %13 : vector<8x8xf32> to vector<8x8xbf16>
    %cst_20 = arith.constant dense<0.000000e+00> : vector<8x8xf32>
    %29 = tpu.matmul %27, %28, %cst_20 {dimension_numbers = #tpu.dot_dimension_numbers<[1], [0], [0], [1], [0, 0, 1, 1], [], []>} : vector<8x8xbf16>, vector<8x8xbf16>, vector<8x8xf32> -> vector<8x8xf32>
    %30 = arith.truncf %29 : vector<8x8xf32> to vector<8x8xbf16>
    %c0_21 = arith.constant 0 : index
    %c0_22 = arith.constant 0 : index
    %c0_23 = arith.constant 0 : index
    %31 = vector.load %arg7[%c0_21, %c0_22, %c0_23] : memref<4x8x32xbf16, #tpu.memory_space<vmem>>, vector<1x8x32xbf16>
    %32 = vector.shape_cast %31 : vector<1x8x32xbf16> to vector<8x32xbf16>
    %cst_24 = arith.constant dense<0.000000e+00> : vector<8x32xf32>
    %33 = tpu.matmul %30, %32, %cst_24 {dimension_numbers = #tpu.dot_dimension_numbers<[1], [0], [0], [1], [0, 0, 1, 1], [], []>} : vector<8x8xbf16>, vector<8x32xbf16>, vector<8x32xf32> -> vector<8x32xf32>
    %34 = arith.addf %4, %33 : vector<8x32xf32>
    %c1 = arith.constant 1 : index
    %c0_25 = arith.constant 0 : index
    %c0_26 = arith.constant 0 : index
    %35 = vector.load %arg4[%c1, %c0_25, %c0_26] : memref<4x32x8xbf16, #tpu.memory_space<vmem>>, vector<1x32x8xbf16>
    %36 = vector.shape_cast %35 : vector<1x32x8xbf16> to vector<32x8xbf16>
    %cst_27 = arith.constant dense<0.000000e+00> : vector<8x8xf32>
    %37 = tpu.matmul %1, %36, %cst_27 {dimension_numbers = #tpu.dot_dimension_numbers<[1], [0], [0], [1], [0, 0, 1, 1], [], []>} : vector<8x32xbf16>, vector<32x8xbf16>, vector<8x8xf32> -> vector<8x8xf32>
    %c1_28 = arith.constant 1 : index
    %c0_29 = arith.constant 0 : index
    %c0_30 = arith.constant 0 : index
    %38 = vector.load %arg5[%c1_28, %c0_29, %c0_30] : memref<4x32x8xbf16, #tpu.memory_space<vmem>>, vector<1x32x8xbf16>
    %39 = vector.shape_cast %38 : vector<1x32x8xbf16> to vector<32x8xbf16>
    %cst_31 = arith.constant dense<0.000000e+00> : vector<8x8xf32>
    %40 = tpu.matmul %3, %39, %cst_31 {dimension_numbers = #tpu.dot_dimension_numbers<[1], [0], [0], [1], [0, 0, 1, 1], [], []>} : vector<8x32xbf16>, vector<32x8xbf16>, vector<8x8xf32> -> vector<8x8xf32>
    %c1_32 = arith.constant 1 : index
    %c0_33 = arith.constant 0 : index
    %c0_34 = arith.constant 0 : index
    %41 = vector.load %arg6[%c1_32, %c0_33, %c0_34] : memref<4x32x8xbf16, #tpu.memory_space<vmem>>, vector<1x32x8xbf16>
    %42 = vector.shape_cast %41 : vector<1x32x8xbf16> to vector<32x8xbf16>
    %cst_35 = arith.constant dense<0.000000e+00> : vector<8x8xf32>
    %43 = tpu.matmul %3, %42, %cst_35 {dimension_numbers = #tpu.dot_dimension_numbers<[1], [0], [0], [1], [0, 0, 1, 1], [], []>} : vector<8x32xbf16>, vector<32x8xbf16>, vector<8x8xf32> -> vector<8x8xf32>
    %44 = arith.truncf %37 : vector<8x8xf32> to vector<8x8xbf16>
    %45 = arith.truncf %40 : vector<8x8xf32> to vector<8x8xbf16>
    %cst_36 = arith.constant dense<0.000000e+00> : vector<8x8xf32>
    %46 = tpu.matmul %44, %45, %cst_36 {dimension_numbers = #tpu.dot_dimension_numbers<[1], [1], [0], [0], [0, 0, 1, 0], [], []>} : vector<8x8xbf16>, vector<8x8xbf16>, vector<8x8xf32> -> vector<8x8xf32>
    %cst_37 = arith.constant dense<0xFF800000> : vector<8xf32>
    %47 = vector.multi_reduction <maximumf>, %46, %cst_37 [1] : vector<8x8xf32> to vector<8xf32>
    %48 = vector.shape_cast %47 : vector<8xf32> to vector<8x1xf32>
    %49 = vector.broadcast %48 : vector<8x1xf32> to vector<8x8xf32>
    %50 = arith.subf %46, %49 : vector<8x8xf32>
    %51 = math.exp %50 : vector<8x8xf32>
    %cst_38 = arith.constant dense<0.000000e+00> : vector<8xf32>
    %52 = vector.multi_reduction <add>, %51, %cst_38 [1] : vector<8x8xf32> to vector<8xf32>
    %53 = vector.shape_cast %52 : vector<8xf32> to vector<8x1xf32>
    %54 = tpu.reciprocal %53 {approx = true} : vector<8x1xf32> -> vector<8x1xf32>
    %55 = vector.broadcast %54 : vector<8x1xf32> to vector<8x8xf32>
    %56 = arith.mulf %51, %55 : vector<8x8xf32>
    %57 = arith.truncf %56 : vector<8x8xf32> to vector<8x8xbf16>
    %58 = arith.truncf %43 : vector<8x8xf32> to vector<8x8xbf16>
    %cst_39 = arith.constant dense<0.000000e+00> : vector<8x8xf32>
    %59 = tpu.matmul %57, %58, %cst_39 {dimension_numbers = #tpu.dot_dimension_numbers<[1], [0], [0], [1], [0, 0, 1, 1], [], []>} : vector<8x8xbf16>, vector<8x8xbf16>, vector<8x8xf32> -> vector<8x8xf32>
    %60 = arith.truncf %59 : vector<8x8xf32> to vector<8x8xbf16>
    %c1_40 = arith.constant 1 : index
    %c0_41 = arith.constant 0 : index
    %c0_42 = arith.constant 0 : index
    %61 = vector.load %arg7[%c1_40, %c0_41, %c0_42] : memref<4x8x32xbf16, #tpu.memory_space<vmem>>, vector<1x8x32xbf16>
    %62 = vector.shape_cast %61 : vector<1x8x32xbf16> to vector<8x32xbf16>
    %cst_43 = arith.constant dense<0.000000e+00> : vector<8x32xf32>
    %63 = tpu.matmul %60, %62, %cst_43 {dimension_numbers = #tpu.dot_dimension_numbers<[1], [0], [0], [1], [0, 0, 1, 1], [], []>} : vector<8x8xbf16>, vector<8x32xbf16>, vector<8x32xf32> -> vector<8x32xf32>
    %64 = arith.addf %34, %63 : vector<8x32xf32>
    %c2 = arith.constant 2 : index
    %c0_44 = arith.constant 0 : index
    %c0_45 = arith.constant 0 : index
    %65 = vector.load %arg4[%c2, %c0_44, %c0_45] : memref<4x32x8xbf16, #tpu.memory_space<vmem>>, vector<1x32x8xbf16>
    %66 = vector.shape_cast %65 : vector<1x32x8xbf16> to vector<32x8xbf16>
    %cst_46 = arith.constant dense<0.000000e+00> : vector<8x8xf32>
    %67 = tpu.matmul %1, %66, %cst_46 {dimension_numbers = #tpu.dot_dimension_numbers<[1], [0], [0], [1], [0, 0, 1, 1], [], []>} : vector<8x32xbf16>, vector<32x8xbf16>, vector<8x8xf32> -> vector<8x8xf32>
    %c2_47 = arith.constant 2 : index
    %c0_48 = arith.constant 0 : index
    %c0_49 = arith.constant 0 : index
    %68 = vector.load %arg5[%c2_47, %c0_48, %c0_49] : memref<4x32x8xbf16, #tpu.memory_space<vmem>>, vector<1x32x8xbf16>
    %69 = vector.shape_cast %68 : vector<1x32x8xbf16> to vector<32x8xbf16>
    %cst_50 = arith.constant dense<0.000000e+00> : vector<8x8xf32>
    %70 = tpu.matmul %3, %69, %cst_50 {dimension_numbers = #tpu.dot_dimension_numbers<[1], [0], [0], [1], [0, 0, 1, 1], [], []>} : vector<8x32xbf16>, vector<32x8xbf16>, vector<8x8xf32> -> vector<8x8xf32>
    %c2_51 = arith.constant 2 : index
    %c0_52 = arith.constant 0 : index
    %c0_53 = arith.constant 0 : index
    %71 = vector.load %arg6[%c2_51, %c0_52, %c0_53] : memref<4x32x8xbf16, #tpu.memory_space<vmem>>, vector<1x32x8xbf16>
    %72 = vector.shape_cast %71 : vector<1x32x8xbf16> to vector<32x8xbf16>
    %cst_54 = arith.constant dense<0.000000e+00> : vector<8x8xf32>
    %73 = tpu.matmul %3, %72, %cst_54 {dimension_numbers = #tpu.dot_dimension_numbers<[1], [0], [0], [1], [0, 0, 1, 1], [], []>} : vector<8x32xbf16>, vector<32x8xbf16>, vector<8x8xf32> -> vector<8x8xf32>
    %74 = arith.truncf %67 : vector<8x8xf32> to vector<8x8xbf16>
    %75 = arith.truncf %70 : vector<8x8xf32> to vector<8x8xbf16>
    %cst_55 = arith.constant dense<0.000000e+00> : vector<8x8xf32>
    %76 = tpu.matmul %74, %75, %cst_55 {dimension_numbers = #tpu.dot_dimension_numbers<[1], [1], [0], [0], [0, 0, 1, 0], [], []>} : vector<8x8xbf16>, vector<8x8xbf16>, vector<8x8xf32> -> vector<8x8xf32>
    %cst_56 = arith.constant dense<0xFF800000> : vector<8xf32>
    %77 = vector.multi_reduction <maximumf>, %76, %cst_56 [1] : vector<8x8xf32> to vector<8xf32>
    %78 = vector.shape_cast %77 : vector<8xf32> to vector<8x1xf32>
    %79 = vector.broadcast %78 : vector<8x1xf32> to vector<8x8xf32>
    %80 = arith.subf %76, %79 : vector<8x8xf32>
    %81 = math.exp %80 : vector<8x8xf32>
    %cst_57 = arith.constant dense<0.000000e+00> : vector<8xf32>
    %82 = vector.multi_reduction <add>, %81, %cst_57 [1] : vector<8x8xf32> to vector<8xf32>
    %83 = vector.shape_cast %82 : vector<8xf32> to vector<8x1xf32>
    %84 = tpu.reciprocal %83 {approx = true} : vector<8x1xf32> -> vector<8x1xf32>
    %85 = vector.broadcast %84 : vector<8x1xf32> to vector<8x8xf32>
    %86 = arith.mulf %81, %85 : vector<8x8xf32>
    %87 = arith.truncf %86 : vector<8x8xf32> to vector<8x8xbf16>
    %88 = arith.truncf %73 : vector<8x8xf32> to vector<8x8xbf16>
    %cst_58 = arith.constant dense<0.000000e+00> : vector<8x8xf32>
    %89 = tpu.matmul %87, %88, %cst_58 {dimension_numbers = #tpu.dot_dimension_numbers<[1], [0], [0], [1], [0, 0, 1, 1], [], []>} : vector<8x8xbf16>, vector<8x8xbf16>, vector<8x8xf32> -> vector<8x8xf32>
    %90 = arith.truncf %89 : vector<8x8xf32> to vector<8x8xbf16>
    %c2_59 = arith.constant 2 : index
    %c0_60 = arith.constant 0 : index
    %c0_61 = arith.constant 0 : index
    %91 = vector.load %arg7[%c2_59, %c0_60, %c0_61] : memref<4x8x32xbf16, #tpu.memory_space<vmem>>, vector<1x8x32xbf16>
    %92 = vector.shape_cast %91 : vector<1x8x32xbf16> to vector<8x32xbf16>
    %cst_62 = arith.constant dense<0.000000e+00> : vector<8x32xf32>
    %93 = tpu.matmul %90, %92, %cst_62 {dimension_numbers = #tpu.dot_dimension_numbers<[1], [0], [0], [1], [0, 0, 1, 1], [], []>} : vector<8x8xbf16>, vector<8x32xbf16>, vector<8x32xf32> -> vector<8x32xf32>
    %94 = arith.addf %64, %93 : vector<8x32xf32>
    %c3 = arith.constant 3 : index
    %c0_63 = arith.constant 0 : index
    %c0_64 = arith.constant 0 : index
    %95 = vector.load %arg4[%c3, %c0_63, %c0_64] : memref<4x32x8xbf16, #tpu.memory_space<vmem>>, vector<1x32x8xbf16>
    %96 = vector.shape_cast %95 : vector<1x32x8xbf16> to vector<32x8xbf16>
    %cst_65 = arith.constant dense<0.000000e+00> : vector<8x8xf32>
    %97 = tpu.matmul %1, %96, %cst_65 {dimension_numbers = #tpu.dot_dimension_numbers<[1], [0], [0], [1], [0, 0, 1, 1], [], []>} : vector<8x32xbf16>, vector<32x8xbf16>, vector<8x8xf32> -> vector<8x8xf32>
    %c3_66 = arith.constant 3 : index
    %c0_67 = arith.constant 0 : index
    %c0_68 = arith.constant 0 : index
    %98 = vector.load %arg5[%c3_66, %c0_67, %c0_68] : memref<4x32x8xbf16, #tpu.memory_space<vmem>>, vector<1x32x8xbf16>
    %99 = vector.shape_cast %98 : vector<1x32x8xbf16> to vector<32x8xbf16>
    %cst_69 = arith.constant dense<0.000000e+00> : vector<8x8xf32>
    %100 = tpu.matmul %3, %99, %cst_69 {dimension_numbers = #tpu.dot_dimension_numbers<[1], [0], [0], [1], [0, 0, 1, 1], [], []>} : vector<8x32xbf16>, vector<32x8xbf16>, vector<8x8xf32> -> vector<8x8xf32>
    %c3_70 = arith.constant 3 : index
    %c0_71 = arith.constant 0 : index
    %c0_72 = arith.constant 0 : index
    %101 = vector.load %arg6[%c3_70, %c0_71, %c0_72] : memref<4x32x8xbf16, #tpu.memory_space<vmem>>, vector<1x32x8xbf16>
    %102 = vector.shape_cast %101 : vector<1x32x8xbf16> to vector<32x8xbf16>
    %cst_73 = arith.constant dense<0.000000e+00> : vector<8x8xf32>
    %103 = tpu.matmul %3, %102, %cst_73 {dimension_numbers = #tpu.dot_dimension_numbers<[1], [0], [0], [1], [0, 0, 1, 1], [], []>} : vector<8x32xbf16>, vector<32x8xbf16>, vector<8x8xf32> -> vector<8x8xf32>
    %104 = arith.truncf %97 : vector<8x8xf32> to vector<8x8xbf16>
    %105 = arith.truncf %100 : vector<8x8xf32> to vector<8x8xbf16>
    %cst_74 = arith.constant dense<0.000000e+00> : vector<8x8xf32>
    %106 = tpu.matmul %104, %105, %cst_74 {dimension_numbers = #tpu.dot_dimension_numbers<[1], [1], [0], [0], [0, 0, 1, 0], [], []>} : vector<8x8xbf16>, vector<8x8xbf16>, vector<8x8xf32> -> vector<8x8xf32>
    %cst_75 = arith.constant dense<0xFF800000> : vector<8xf32>
    %107 = vector.multi_reduction <maximumf>, %106, %cst_75 [1] : vector<8x8xf32> to vector<8xf32>
    %108 = vector.shape_cast %107 : vector<8xf32> to vector<8x1xf32>
    %109 = vector.broadcast %108 : vector<8x1xf32> to vector<8x8xf32>
    %110 = arith.subf %106, %109 : vector<8x8xf32>
    %111 = math.exp %110 : vector<8x8xf32>
    %cst_76 = arith.constant dense<0.000000e+00> : vector<8xf32>
    %112 = vector.multi_reduction <add>, %111, %cst_76 [1] : vector<8x8xf32> to vector<8xf32>
    %113 = vector.shape_cast %112 : vector<8xf32> to vector<8x1xf32>
    %114 = tpu.reciprocal %113 {approx = true} : vector<8x1xf32> -> vector<8x1xf32>
    %115 = vector.broadcast %114 : vector<8x1xf32> to vector<8x8xf32>
    %116 = arith.mulf %111, %115 : vector<8x8xf32>
    %117 = arith.truncf %116 : vector<8x8xf32> to vector<8x8xbf16>
    %118 = arith.truncf %103 : vector<8x8xf32> to vector<8x8xbf16>
    %cst_77 = arith.constant dense<0.000000e+00> : vector<8x8xf32>
    %119 = tpu.matmul %117, %118, %cst_77 {dimension_numbers = #tpu.dot_dimension_numbers<[1], [0], [0], [1], [0, 0, 1, 1], [], []>} : vector<8x8xbf16>, vector<8x8xbf16>, vector<8x8xf32> -> vector<8x8xf32>
    %120 = arith.truncf %119 : vector<8x8xf32> to vector<8x8xbf16>
    %c3_78 = arith.constant 3 : index
    %c0_79 = arith.constant 0 : index
    %c0_80 = arith.constant 0 : index
    %121 = vector.load %arg7[%c3_78, %c0_79, %c0_80] : memref<4x8x32xbf16, #tpu.memory_space<vmem>>, vector<1x8x32xbf16>
    %122 = vector.shape_cast %121 : vector<1x8x32xbf16> to vector<8x32xbf16>
    %cst_81 = arith.constant dense<0.000000e+00> : vector<8x32xf32>
    %123 = tpu.matmul %120, %122, %cst_81 {dimension_numbers = #tpu.dot_dimension_numbers<[1], [0], [0], [1], [0, 0, 1, 1], [], []>} : vector<8x8xbf16>, vector<8x32xbf16>, vector<8x32xf32> -> vector<8x32xf32>
    %124 = arith.addf %94, %123 : vector<8x32xf32>
    %c0_82 = arith.constant 0 : index
    %c0_83 = arith.constant 0 : index
    %125 = vector.load %arg8[%c0_82, %c0_83] : memref<1x32xf32, #tpu.memory_space<vmem>>, vector<1x32xf32>
    %126 = vector.shape_cast %125 : vector<1x32xf32> to vector<32xf32>
    %127 = vector.shape_cast %126 : vector<32xf32> to vector<1x32xf32>
    %128 = vector.broadcast %127 : vector<1x32xf32> to vector<8x32xf32>
    %129 = arith.addf %124, %128 : vector<8x32xf32>
    %c0_84 = arith.constant 0 : index
    %c0_85 = arith.constant 0 : index
    %c0_86 = arith.constant 0 : index
    %130 = vector.load %arg9[%c0_84, %c0_85, %c0_86] : memref<1x8x32xf32, #tpu.memory_space<vmem>>, vector<1x8x32xf32>
    %131 = vector.shape_cast %130 : vector<1x8x32xf32> to vector<8x32xf32>
    %132 = vector.shape_cast %129 : vector<8x32xf32> to vector<1x8x32xf32>
    tpu.vector_store %arg9[%c0_84, %c0_85, %c0_86], %132 {strides = array<i32>} : memref<1x8x32xf32, #tpu.memory_space<vmem>>, vector<1x8x32xf32>,
    return
  }
  func.func @transform_0(%arg0: i32, %arg1: i32) -> (i32, i32, i32) {
    %c0_i32 = arith.constant 0 : i32
    %c0_i32_0 = arith.constant 0 : i32
    return %arg0, %arg1, %c0_i32 : i32, i32, i32
  }
  func.func @transform_1(%arg0: i32, %arg1: i32) -> (i32, i32, i32) {
    %c0_i32 = arith.constant 0 : i32
    %c0_i32_0 = arith.constant 0 : i32
    %c0_i32_1 = arith.constant 0 : i32
    return %arg0, %c0_i32, %c0_i32_0 : i32, i32, i32
  }
  func.func @transform_2(%arg0: i32, %arg1: i32) -> (i32, i32, i32) {
    %c0_i32 = arith.constant 0 : i32
    %c0_i32_0 = arith.constant 0 : i32
    %c0_i32_1 = arith.constant 0 : i32
    %c0_i32_2 = arith.constant 0 : i32
    return %c0_i32, %c0_i32_0, %c0_i32_1 : i32, i32, i32
  }
  func.func @transform_3(%arg0: i32, %arg1: i32) -> (i32, i32, i32) {
    %c0_i32 = arith.constant 0 : i32
    %c0_i32_0 = arith.constant 0 : i32
    %c0_i32_1 = arith.constant 0 : i32
    %c0_i32_2 = arith.constant 0 : i32
    return %c0_i32, %c0_i32_0, %c0_i32_1 : i32, i32, i32
  }
  func.func @transform_4(%arg0: i32, %arg1: i32) -> (i32, i32, i32) {
    %c0_i32 = arith.constant 0 : i32
    %c0_i32_0 = arith.constant 0 : i32
    %c0_i32_1 = arith.constant 0 : i32
    %c0_i32_2 = arith.constant 0 : i32
    return %c0_i32, %c0_i32_0, %c0_i32_1 : i32, i32, i32
  }
  func.func @transform_5(%arg0: i32, %arg1: i32) -> (i32, i32, i32) {
    %c0_i32 = arith.constant 0 : i32
    %c0_i32_0 = arith.constant 0 : i32
    %c0_i32_1 = arith.constant 0 : i32
    %c0_i32_2 = arith.constant 0 : i32
    return %c0_i32, %c0_i32_0, %c0_i32_1 : i32, i32, i32
  }
  func.func @transform_6(%arg0: i32, %arg1: i32) -> (i32, i32) {
    %c0_i32 = arith.constant 0 : i32
    %c0_i32_0 = arith.constant 0 : i32
    %c0_i32_1 = arith.constant 0 : i32
    return %c0_i32, %c0_i32_0 : i32, i32
  }
  func.func @transform_7(%arg0: i32, %arg1: i32) -> (i32, i32, i32) {
    %c0_i32 = arith.constant 0 : i32
    %c0_i32_0 = arith.constant 0 : i32
    return %arg0, %arg1, %c0_i32 : i32, i32, i32
  }
}

</mosaic_0001>

<bundles_post_ra>
// kernel: tpu_custom_call.1
= control target key start
LH: loop header
LB: loop body
LE: loop exit
PB: predicated region body
PF: predicated region fallthrough
CT: control target
= control target key end

     0   :  { %12 = vsyncpa [#allocation3], 0  ;;  %s2642_s0 = inlined_call_operand.vmem [shape: bf16[2,8,32], index: 0, kind: input, shape index: {}]   ;;  %s2643_s1 = inlined_call_operand.vmem [shape: bf16[2,8,32], index: 1, kind: input, shape index: {}]   ;;  %s2644_s2 = inlined_call_operand.vmem [shape: bf16[4,32,8], index: 2, kind: input, shape index: {}]   ;;  %s2645_s3 = inlined_call_operand.vmem [shape: bf16[4,32,8], index: 3, kind: input, shape index: {}]   ;;  %s2646_s4 = inlined_call_operand.vmem [shape: bf16[4,32,8], index: 4, kind: input, shape index: {}]   ;;  %s2647_s5 = inlined_call_operand.vmem [shape: bf16[4,8,32], index: 5, kind: input, shape index: {}]   ;;  %s2648_s6 = inlined_call_operand.vmem [shape: f32[1,32], index: 6, kind: input, shape index: {}]   ;;  %s2649_s7 = inlined_call_operand.hbm [shape: f32[2,8,32], index: 7, kind: output, shape index: {}]  }
   0x1   :  { %14 = vsyncpa [#allocation3 + $0x1], 0  ;;  %s2289_s24 = smov 0   ;;  %s2291_s25 = smov 0  }
   0x2   :  { %s2293_s26 = smov 0   ;;  %s2295_s27 = smov 0  }
   0x3   :  { %s2297_s28 = smov 0   ;;  %s2299_s29 = smov 0  }
   0x4 LB: > { %s1741_s30 = sadd.s32 4294967295, %s2244_s29   ;;  %s1742_s8 = sadd.s32 4294967294, %s2244_s29   ;;  %s2244_s29 = sphi %s2299_s29, %s20_s29   ;;  %s2240_s28 = sphi %s2297_s28, %s2656_s28   ;;  %s2236_s27 = sphi %s2295_s27, %s2655_s27   ;;  %s2232_s26 = sphi %s2293_s26, %s2654_s26   ;;  %s2228_s25 = sphi %s2291_s25, %s2653_s25   ;;  %s2224_s24 = sphi %s2289_s24, %s2652_s24  }
   0x5   : > { %s32_s9 = sadd.s32 1, %s2240_s28  ;;  %s200_s10 = sadd.s32 1, %s2232_s26 }
   0x6   : > { %p34_p0 = scmp.ge.s32.totalorder %s32_s9, 2  ;;  %p210_p1 = scmp.ne.s32.totalorder %s2232_s26, %s2228_s25 }
   0x7   : > { %p211_p2 = scmp.eq.s32.totalorder %s1741_s30, 1  ;;  %p216_p3 = scmp.ne.s32.totalorder %s2228_s25, %s2224_s24 }
   0x8   : > { %s2658_s9 = smov (%p34_p0, %s32_s9), 0  ;;  %p217_p5 = scmp.eq.s32.totalorder %s1742_s8, 1 }
   0x9   : > { %p2329_p4 = por %p211_p2, %p210_p1  ;;  %s195_s12 = ssub.s32 %s2240_s28, %s2658_s9 }
   0xa   : > { %p1745_p6 = scmp.ge.s32.totalorder %s2244_s29, 1  ;;  %p198_p7 = scmp.eq.s32.totalorder %s195_s12, 0 }
   0xb   : > { %p2336_p8 = por %p217_p5, %p216_p3  ;;  %p267_p9 = scmp.lt.s32.totalorder %s2244_s29, 3 }
   0xc   : > { %s2342_s14 = scalar_select %p198_p7, %s2232_s26, %s200_s10  }
   0xd   : > { %p268_p10 = pnand %p1745_p6, %p267_p9 }
   0xe   : > { %v2126_v0 = vld [vmem:[%s2645_s3] sm:$0xff] (!%p268_p10)   ;;  %v2246_v1 = vmov (!%p268_p10), 0.0   ;;  %v2127_v2 = vld [vmem:[%s2645_s3 + $0x8] sm:$0xff] (!%p268_p10)   ;;  %vm2247_vm0 = vmmov (!%p268_p10), 0   ;;  %p305_p11 = scmp.lt.s32.totalorder (!%p268_p10), %s2236_s27, 1  ;;  %vm335_vm1 = vcmask (!%p268_p10), 261120  }
   0xf   : > { %271 = sbr.rel (%p268_p10) target bundleno = 3915 (0xf4b), region = 48  ;;  %1909 = vmatprep.subr.bf16.mxu1 (!%p268_p10), %v2246_v1  ;;  %1901 = vmatprep.subr.bf16.mxu0 (!%p268_p10), %v2246_v1  ;;  %v2128_v3 = vld [vmem:[%s2644_s2] sm:$0xff] (!%p268_p10)   ;;  %v2129_v4 = vld [vmem:[%s2644_s2 + $0x8] sm:$0xff] (!%p268_p10)   ;;  %vm496_vm2 = vcmask (!%p268_p10), 64512   ;;  %vm559_vm3 = vcmask (!%p268_p10), 1043456   ;;  %v2134_v36 = vld [vmem:[%s2644_s2 + $0x10] sm:$0xff] (!%p268_p10)  }
  0x10   : > { %1910 = vmatpush3.bf16.msra.mxu1 (!%p268_p10), %v2126_v0  ;;  %1913 = vmatprep.mubr.msk.bf16.mxu1 (!%p268_p10), %vm2247_vm0, %v2246_v1  ;;  %v2130_v18 = vld [vmem:[%s2646_s4] sm:$0xff] (!%p268_p10)   ;;  %v2131_v19 = vld [vmem:[%s2646_s4 + $0x8] sm:$0xff] (!%p268_p10)   ;;  %v2135_v37 = vld [vmem:[%s2644_s2 + $0x18] sm:$0xff] (!%p268_p10)   ;;  %s1838_s18 = sshll.u32 (!%p268_p10), %s2236_s27, 7  ;;  %s2248_s8 = smov (!%p268_p10), [#allocation2]  }
  0x11   : > { %1911 = vmatprep.subr.bf16.mxu1 (!%p268_p10), %v2246_v1  ;;  %1905 = vmatprep.mubr.msk.bf16.mxu0 (!%p268_p10), %vm2247_vm0, %v2246_v1  ;;  %v2132_v41 = vld [vmem:[%s2645_s3 + $0x10] sm:$0xff] (!%p268_p10)   ;;  %v2133_v43 = vld [vmem:[%s2645_s3 + $0x18] sm:$0xff] (!%p268_p10)   ;;  %s2594_s23 = scalar_lea.hbm (!%p268_p10), %s2649_s7, %s1838_s18  ;;  %s2170_s10 = sshll.u32 (!%p268_p10), %s2248_s8, 4  ;;  %s2171_s10 = int_to_ptr.vmem [resolvable:$false] %s2170_s10 }
  0x12   : > { %1902 = vmatpush3.bf16.msra.mxu0 (!%p268_p10), %v2128_v3  ;;  %v2136_v59 = vld [vmem:[%s2646_s4 + $0x10] sm:$0xff] (!%p268_p10)   ;;  %v2137_v60 = vld [vmem:[%s2646_s4 + $0x18] sm:$0xff] (!%p268_p10)  }
  0x13   : > { %1903 = vmatprep.subr.bf16.mxu0 (!%p268_p10), %v2246_v1 }
  0x14   : > { %1912 = vmatpush3.bf16.msra.mxu1 (!%p268_p10), %v2127_v2 }
  0x15   : > { %1925 = vmatprep.subr.bf16.mxu1 (!%p268_p10), %v2246_v1 }
  0x16   : > { %s306_s21 = scalar_select %p305_p11, %s2236_s27, 1  ;;  %1904 = vmatpush3.bf16.msra.mxu0 %v2129_v4 }
  0x17   : > { %1917 = vmatprep.subr.bf16.mxu0 %v2246_v1 }
  0x18   : > { %s1747_s30 = sshll.u32 %s306_s21, 2 }
  0x19   : > { %s315_s12 = scalar_lea.vmem %s2643_s1, %s1747_s30  ;;  %s311_s17 = scalar_lea.vmem %s2642_s0, %s1747_s30 }
  0x1a   : > { %v2373_v5 = vld [vmem:[%s315_s12] sm:$0xf]  ;;  %s302_s12 = sand.u32 1, %s2228_s25  }
  0x1b   : > { %v2375_v6 = vld [vmem:[%s311_s17] sm:$0xf]  ;;  %1914 = vmatmul.mubr.msk.bf16.vlgmr.msra.gmra.mrb[0].mxu1 %vm335_vm1, %v2373_v5  ;;  %s1746_s15 = sshll.u32 %s302_s12, 3  ;;  %s1644_s27 = scalar_lea.sflag [#allocation3], %s302_s12 }
  0x1c   : > { %1927 = vmatprep.mubr.msk.bf16.mxu1 %vm2247_vm0, %v2246_v1  ;;  %1906 = vmatmul.mubr.msk.bf16.vlgmr.msra.gmra.mrb[0].mxu0 %vm335_vm1, %v2375_v6  ;;  %s304_s19 = scalar_lea.vmem [#allocation2], %s1746_s15  ;;  %s2172_s15 = scalar_lea.vmem %s2171_s10, 256 }
  0x1d   : > { %1921 = vmatprep.mubr.msk.bf16.mxu0 %vm2247_vm0, %v2246_v1  ;;  %1918 = vmatpush3.bf16.msra.mxu0 %v2130_v18  ;;  %s1658_s20 = sshll.u32 %s304_s19, 4  ;;  %s2596_s20 = int_to_ptr.vmem [resolvable:$true] %s1658_s20 }
  0x1e   : > { %1919 = vmatprep.subr.bf16.mxu0 %v2246_v1  ;;  %s2166_s30 = scalar_lea.vmem %s2596_s20, 128  ;;  %p2173_p1 = scmp.lt.s32.totalorder %s2596_s20, %s2171_s10 }
  0x1f   : > { %p2167_p12 = scmp.ne.s32.totalorder %s2596_s20, %s2166_s30  ;;  %p2174_p2 = scmp.lt.s32.totalorder %s2172_s15, %s2166_s30 }
  0x21   : > { %1920 = vmatpush3.bf16.msra.mxu0 %v2131_v19  ;;  %p2168_p13 = pnand %p2167_p12, %p2329_p4  ;;  %p2175_p3 = por %p2174_p2, %p2173_p1 }
  0x22   : > { %1931 = vmatprep.subr.bf16.mxu0 %v2246_v1 }
  0x23   : > { %p2169_p0 = pneg %p2168_p13 }
  0x24   : > { %1922 = vmatmul.mubr.msk.bf16.vlgmr.msra.gmra.mrb[4].mxu0 %vm335_vm1, %v2373_v5 }
  0x25   : > { %1933 = vmatprep.mubr.msk.bf16.mxu0 %vm2247_vm0, %v2246_v1  ;;  %p2176_p5 = pnand %p2175_p3, %p2169_p0 }
  0xee   : > { %v432_v7 = vpop.f32.mrb[0].mxu1 }
  0xef   : > { %v495_v8 = vpack.c.bf16 %v432_v7, %v432_v7  ;;  %v1915_v9 = vpop.f32.mrb[1].mxu1  ;;  %v373_v11 = vpop.f32.mrb[0].mxu0 }
  0xf0   : > { %v435_v10 = vpop.f32.mrb[2].mxu1  ;;  %v1907_v14 = vpop.f32.mrb[1].mxu0  ;;  %v494_v17 = vpack.c.bf16 %v373_v11, %v373_v11 }
  0xf1   : > { %v501_v12 = vsel %vm496_vm2, %v495_v8, 0  ;;  %v1916_v13 = vpop.f32.mrb[3].mxu1  ;;  %v376_v15 = vpop.f32.mrb[2].mxu0 }
  0xf2   : > { %1926 = vmatpush3.bf16.xpose.msra.mxu1 %v501_v12  ;;  %v1908_v16 = vpop.f32.mrb[3].mxu0 }
  0xf3   : > { %1937 = vmatprep.subr.bf16.mxu1 %v2246_v1  ;;  %v1783_v16 = vld [vmem:[%s2647_s5 + $0x4] sm:$0xf] }
  0xf7   : > { %v488_v30 = vpop.f32.mrb[4].mxu0 }
  0xf8   : > { %v1923_v31 = vpop.f32.mrb[5].mxu0  ;;  %v555_v34 = vpack.c.bf16 %v488_v30, %v488_v30 }
  0xf9   : > { %1928 = vmatmul.mubr.msk.bf16.vlgmr.msra.gmra.mrb[4].mxu1 %vm496_vm2, %v494_v17  ;;  %v491_v32 = vpop.f32.mrb[6].mxu0  ;;  %v890_v17 = vsel %vm559_vm3, %v1783_v16, 0 }
  0xfa   : > { %1941 = vmatprep.mubr.msk.bf16.mxu1 %vm2247_vm0, %v2246_v1  ;;  %v1924_v33 = vpop.f32.mrb[7].mxu0  ;;  %v561_v35 = vsel %vm559_vm3, %v555_v34, 0  ;;  %1938 = vmatpush3.bf16.msra.mxu1 %v2134_v36 }
  0xfb   : > { %1932 = vmatpush3.bf16.msra.mxu0 %v561_v35  ;;  %1939 = vmatprep.subr.bf16.mxu1 %v2246_v1  ;;  %v2141_v33 = vld [vmem:[%s2644_s2 + $0x28] sm:$0xff]  }
  0xfc   : > { %1945 = vmatprep.subr.bf16.mxu0 %v2246_v1 }
  0xfe   : > { %1940 = vmatpush3.bf16.msra.mxu1 %v2135_v37 }
  0xff   : > { %1953 = vmatprep.subr.bf16.mxu1 %v2246_v1 }
 0x101   : > { %1942 = vmatmul.mubr.msk.bf16.vlgmr.msra.gmra.mrb[8].mxu1 %vm335_vm1, %v2375_v6 }
 0x102   : > { %1957 = vmatprep.mubr.msk.bf16.mxu1 %vm2247_vm0, %v2246_v1  ;;  %1954 = vmatpush3.bf16.msra.mxu1 %v2136_v59 }
 0x103   : > { %1955 = vmatprep.subr.bf16.mxu1 %v2246_v1 }
 0x106   : > { %1956 = vmatpush3.bf16.msra.mxu1 %v2137_v60 }
 0x107   : > { %1967 = vmatprep.subr.bf16.mxu1 %v2246_v1 }
 0x109   : > { %1958 = vmatmul.mubr.msk.bf16.vlgmr.msra.gmra.mrb[12].mxu1 %vm335_vm1, %v2373_v5 }
 0x10a   : > { %1969 = vmatprep.mubr.msk.bf16.mxu1 %vm2247_vm0, %v2246_v1 }
 0x1cc   : > { %v537_v20 = vpop.f32.mrb[4].mxu1 }
 0x1cd   : > { %v1929_v21 = vpop.f32.mrb[5].mxu1  ;;  %v543_v22 = vsel %vm496_vm2, %v537_v20, -inf }
 0x1ce   : > { %544 = vmax.xlane.f32.xlu0 %v543_v22  ;;  %v540_v23 = vpop.f32.mrb[6].mxu1 }
 0x1cf   : > { %v1930_v24 = vpop.f32.mrb[7].mxu1 }
 0x1d0   : > { %v2138_v24 = vld [vmem:[%s2645_s3 + $0x20] sm:$0xff]  }
 0x1d4   : > { %v656_v44 = vpop.f32.mrb[8].mxu1 }
 0x1d5   : > { %v1943_v45 = vpop.f32.mrb[9].mxu1  ;;  %v776_v58 = vpack.c.bf16 %v656_v44, %v656_v44 }
 0x1d6   : > { %v659_v46 = vpop.f32.mrb[10].mxu1 }
 0x1d7   : > { %v1944_v47 = vpop.f32.mrb[11].mxu1 }
 0x1dc   : > { %v770_v10 = vpop.f32.mrb[12].mxu1 }
 0x1dd   : > { %v1959_v11 = vpop.f32.mrb[13].mxu1  ;;  %v836_v14 = vpack.c.bf16 %v770_v10, %v770_v10 }
 0x1de   : > { %v773_v12 = vpop.f32.mrb[14].mxu1  ;;  %v1809_v11 = vld [vmem:[%s2647_s5 + $0x8] sm:$0xf] }
 0x1df   : > { %v1960_v13 = vpop.f32.mrb[15].mxu1  ;;  %v841_v15 = vsel %vm559_vm3, %v836_v14, 0  ;;  %v1263_v12 = vsel %vm559_vm3, %v1809_v11, 0 }
 0x1e0   : > { %1968 = vmatpush3.bf16.msra.mxu1 %v841_v15 }
 0x1e1   : > { %1979 = vmatprep.subr.bf16.mxu1 %v2246_v1 }
 0x25b   : > { %v545_v25 = vpop.xlane.xlu0 %544 }
 0x25c   : > { %v546_v26 = vsub.f32 %v537_v20, %v545_v25  ;;  %v604_v20 = vld [vmem:[%s2647_s5] sm:$0xf] }
 0x25d   : > { %v936_v23 = vsel %vm559_vm3, %v604_v20, 0  ;;  %v2144_v20 = vld [vmem:[%s2645_s3 + $0x30] sm:$0xff]  }
 0x25e   : > { %v547_v27 = vmul.f32 1.442695, %v546_v26  ;;  %v2139_v26 = vld [vmem:[%s2645_s3 + $0x28] sm:$0xff]  }
 0x260   : > { %2150 = vpow2.f32 %v547_v27 }
 0x26a   : > { %v2151_v28 = vpop.eup %2150 }
 0x26b   : > { %v549_v29 = vsel %vm496_vm2, %v2151_v28, 0.0 }
 0x26c   : > { %550 = vadd.xlane.f32.xlu0 %v549_v29 }
 0x2f9   : > { %v551_v38 = vpop.xlane.xlu0 %550 }
 0x2fa   : > { %2152 = vrcp.f32 %v551_v38 }
 0x304   : > { %v2153_v39 = vpop.eup %2152 }
 0x305   : > { %v553_v40 = vmul.f32 %v2153_v39, %v2151_v28  ;;  %v2140_v28 = vld [vmem:[%s2644_s2 + $0x20] sm:$0xff]  }
 0x307   : > { %v554_v42 = vpack.c.bf16 %v553_v40, %v553_v40 }
 0x309   : > { %1934 = vmatmul.mubr.msk.bf16.vlgmr.msra.gmra.mrb[8].mxu0 %vm496_vm2, %v554_v42 }
 0x30a   : > { %1946 = vmatpush3.bf16.msra.mxu0 %v2132_v41  ;;  %1949 = vmatprep.mubr.msk.bf16.mxu0 %vm2247_vm0, %v2246_v1 }
 0x30b   : > { %1947 = vmatprep.subr.bf16.mxu0 %v2246_v1 }
 0x30e   : > { %1948 = vmatpush3.bf16.msra.mxu0 %v2133_v43 }
 0x30f   : > { %1961 = vmatprep.subr.bf16.mxu0 %v2246_v1 }
 0x311   : > { %1950 = vmatmul.mubr.msk.bf16.vlgmr.msra.gmra.mrb[12].mxu0 %vm335_vm1, %v2373_v5 }
 0x312   : > { %1963 = vmatprep.mubr.msk.bf16.mxu0 %vm2247_vm0, %v2246_v1 }
 0x3dc   : > { %v597_v48 = vpop.f32.mrb[8].mxu0 }
 0x3dd   : > { %v1935_v49 = vpop.f32.mrb[9].mxu0  ;;  %v603_v25 = vpack.c.bf16 %v597_v48, %v597_v48 }
 0x3de   : > { %v600_v50 = vpop.f32.mrb[10].mxu0 }
 0x3df   : > { %v1936_v51 = vpop.f32.mrb[11].mxu0 }
 0x3e4   : > { %v713_v52 = vpop.f32.mrb[12].mxu0 }
 0x3e5   : > { %v777_v53 = vpack.c.bf16 %v713_v52, %v713_v52  ;;  %v1951_v54 = vpop.f32.mrb[13].mxu0 }
 0x3e6   : > { %v716_v55 = vpop.f32.mrb[14].mxu0  ;;  %v2142_v54 = vld [vmem:[%s2646_s4 + $0x20] sm:$0xff]  }
 0x3e7   : > { %v782_v56 = vsel %vm496_vm2, %v777_v53, 0  ;;  %v1952_v57 = vpop.f32.mrb[15].mxu0  ;;  %v2143_v55 = vld [vmem:[%s2646_s4 + $0x28] sm:$0xff]  }
 0x3e8   : > { %1962 = vmatpush3.bf16.xpose.msra.mxu0 %v782_v56 }
 0x3e9   : > { %1973 = vmatprep.subr.bf16.mxu0 %v2246_v1 }
 0x3ef   : > { %1964 = vmatmul.mubr.msk.bf16.vlgmr.msra.gmra.mrb[16].mxu0 %vm496_vm2, %v776_v58 }
 0x3f0   : > { %1975 = vmatprep.mubr.msk.bf16.mxu0 %vm2247_vm0, %v2246_v1  ;;  %1974 = vmatpush3.bf16.msra.mxu0 %v890_v17  ;;  %v2146_v17 = vld [vmem:[%s2644_s2 + $0x30] sm:$0xff]  }
 0x3f1   : > { %1985 = vmatprep.subr.bf16.mxu0 %v2246_v1 }
 0x4c2   : > { %v818_v61 = vpop.f32.mrb[16].mxu0 }
 0x4c3   : > { %v1965_v62 = vpop.f32.mrb[17].mxu0  ;;  %v824_v63 = vsel %vm496_vm2, %v818_v61, -inf }
 0x4c4   : > { %825 = vmax.xlane.f32.xlu1 %v824_v63  ;;  %v821_v0 = vpop.f32.mrb[18].mxu0 }
 0x4c5   : > { %v1966_v2 = vpop.f32.mrb[19].mxu0 }
 0x551   : > { %v826_v3 = vpop.xlane.xlu1 %825 }
 0x552   : > { %v827_v4 = vsub.f32 %v818_v61, %v826_v3 }
 0x554   : > { %v828_v7 = vmul.f32 1.442695, %v827_v4 }
 0x556   : > { %2154 = vpow2.f32 %v828_v7 }
 0x560   : > { %v2155_v8 = vpop.eup %2154 }
 0x561   : > { %v830_v9 = vsel %vm496_vm2, %v2155_v8, 0.0 }
 0x562   : > { %831 = vadd.xlane.f32.xlu1 %v830_v9 }
 0x5ef   : > { %v832_v18 = vpop.xlane.xlu1 %831 }
 0x5f0   : > { %2156 = vrcp.f32 %v832_v18  ;;  %v2147_v18 = vld [vmem:[%s2644_s2 + $0x38] sm:$0xff]  }
 0x5fa   : > { %v2157_v19 = vpop.eup %2156 }
 0x5fb   : > { %v834_v21 = vmul.f32 %v2157_v19, %v2155_v8 }
 0x5fd   : > { %v835_v22 = vpack.c.bf16 %v834_v21, %v834_v21 }
 0x5ff   : > { %1970 = vmatmul.mubr.msk.bf16.vlgmr.msra.gmra.mrb[16].mxu1 %vm496_vm2, %v835_v22 }
 0x600   : > { %1980 = vmatpush3.bf16.msra.mxu1 %v936_v23  ;;  %1981 = vmatprep.mubr.msk.bf16.mxu1 %vm2247_vm0, %v2246_v1 }
 0x601   : > { %1993 = vmatprep.subr.bf16.mxu1 %v2246_v1 }
 0x607   : > { %1982 = vmatmul.mubr.msk.bf16.vlgmr.msra.gmra.mrb[20].mxu1 %vm496_vm2, %v603_v25  ;;  %v2145_v25 = vld [vmem:[%s2645_s3 + $0x38] sm:$0xff]  }
 0x608   : > { %1994 = vmatpush3.bf16.msra.mxu1 %v2138_v24  ;;  %1997 = vmatprep.mubr.msk.bf16.mxu1 %vm2247_vm0, %v2246_v1 }
 0x609   : > { %1995 = vmatprep.subr.bf16.mxu1 %v2246_v1 }
 0x60c   : > { %1996 = vmatpush3.bf16.msra.mxu1 %v2139_v26 }
 0x60d   : > { %2009 = vmatprep.subr.bf16.mxu1 %v2246_v1 }
 0x60f   : > { %1998 = vmatmul.mubr.msk.bf16.vlgmr.msra.gmra.mrb[24].mxu1 %vm335_vm1, %v2373_v5 }
 0x610   : > { %2011 = vmatprep.mubr.msk.bf16.mxu1 %vm2247_vm0, %v2246_v1 }
 0x6d2   : > { %v877_v27 = vpop.f32.mrb[16].mxu1 }
 0x6d3   : > { %v883_v29 = vpack.c.bf16 %v877_v27, %v877_v27  ;;  %v1971_v30 = vpop.f32.mrb[17].mxu1 }
 0x6d4   : > { %v880_v31 = vpop.f32.mrb[18].mxu1 }
 0x6d5   : > { %v1972_v32 = vpop.f32.mrb[19].mxu1  ;;  %1976 = vmatmul.mubr.msk.bf16.vlgmr.msra.gmra.mrb[20].mxu0 %vm496_vm2, %v883_v29 }
 0x6d6   : > { %1986 = vmatpush3.bf16.msra.mxu0 %v2140_v28  ;;  %1989 = vmatprep.mubr.msk.bf16.mxu0 %vm2247_vm0, %v2246_v1 }
 0x6d7   : > { %1987 = vmatprep.subr.bf16.mxu0 %v2246_v1 }
 0x6da   : > { %v972_v34 = vpop.f32.mrb[20].mxu1  ;;  %1988 = vmatpush3.bf16.msra.mxu0 %v2141_v33 }
 0x6db   : > { %v1983_v35 = vpop.f32.mrb[21].mxu1  ;;  %2001 = vmatprep.subr.bf16.mxu0 %v2246_v1 }
 0x6dc   : > { %v975_v36 = vpop.f32.mrb[22].mxu1 }
 0x6dd   : > { %v1984_v37 = vpop.f32.mrb[23].mxu1  ;;  %1990 = vmatmul.mubr.msk.bf16.vlgmr.msra.gmra.mrb[24].mxu0 %vm335_vm1, %v2375_v6 }
 0x6de   : > { %2005 = vmatprep.mubr.msk.bf16.mxu0 %vm2247_vm0, %v2246_v1  ;;  %2002 = vmatpush3.bf16.msra.mxu0 %v2142_v54 }
 0x6df   : > { %2003 = vmatprep.subr.bf16.mxu0 %v2246_v1 }
 0x6e2   : > { %v1086_v38 = vpop.f32.mrb[24].mxu1  ;;  %2004 = vmatpush3.bf16.msra.mxu0 %v2143_v55 }
 0x6e3   : > { %v1150_v39 = vpack.c.bf16 %v1086_v38, %v1086_v38  ;;  %v1999_v40 = vpop.f32.mrb[25].mxu1  ;;  %2015 = vmatprep.subr.bf16.mxu0 %v2246_v1 }
 0x6e4   : > { %v1089_v41 = vpop.f32.mrb[26].mxu1 }
 0x6e5   : > { %v1155_v42 = vsel %vm496_vm2, %v1150_v39, 0  ;;  %v2000_v43 = vpop.f32.mrb[27].mxu1  ;;  %2006 = vmatmul.mubr.msk.bf16.vlgmr.msra.gmra.mrb[28].mxu0 %vm335_vm1, %v2373_v5  ;;  %v2148_v41 = vld [vmem:[%s2646_s4 + $0x30] sm:$0xff]  }
 0x6e6   : > { %2010 = vmatpush3.bf16.xpose.msra.mxu1 %v1155_v42  ;;  %2017 = vmatprep.mubr.msk.bf16.mxu0 %vm2247_vm0, %v2246_v1  ;;  %v2149_v42 = vld [vmem:[%s2646_s4 + $0x38] sm:$0xff]  }
 0x6e7   : > { %2021 = vmatprep.subr.bf16.mxu1 %v2246_v1 }
 0x7a8   : > { %v926_v44 = vpop.f32.mrb[20].mxu0 }
 0x7a9   : > { %v2500_v45 = vadd.f32 %v972_v34, %v926_v44  ;;  %v1977_v46 = vpop.f32.mrb[21].mxu0 }
 0x7aa   : > { %v929_v47 = vpop.f32.mrb[22].mxu0 }
 0x7ab   : > { %v1978_v48 = vpop.f32.mrb[23].mxu0 }
 0x7b0   : > { %v1029_v49 = vpop.f32.mrb[24].mxu0 }
 0x7b1   : > { %v1149_v50 = vpack.c.bf16 %v1029_v49, %v1029_v49  ;;  %v1991_v51 = vpop.f32.mrb[25].mxu0 }
 0x7b2   : > { %v1032_v52 = vpop.f32.mrb[26].mxu0 }
 0x7b3   : > { %v1992_v53 = vpop.f32.mrb[27].mxu0  ;;  %2012 = vmatmul.mubr.msk.bf16.vlgmr.msra.gmra.mrb[28].mxu1 %vm496_vm2, %v1149_v50 }
 0x7b4   : > { %2023 = vmatprep.mubr.msk.bf16.mxu1 %vm2247_vm0, %v2246_v1  ;;  %2022 = vmatpush3.bf16.msra.mxu1 %v1263_v12 }
 0x7b5   : > { %2035 = vmatprep.subr.bf16.mxu1 %v2246_v1 }
 0x7b8   : > { %v1143_v3 = vpop.f32.mrb[28].mxu0 }
 0x7b9   : > { %v2007_v4 = vpop.f32.mrb[29].mxu0  ;;  %v1209_v9 = vpack.c.bf16 %v1143_v3, %v1143_v3 }
 0x7ba   : > { %v1146_v7 = vpop.f32.mrb[30].mxu0 }
 0x7bb   : > { %v2008_v8 = vpop.f32.mrb[31].mxu0  ;;  %v1214_v10 = vsel %vm559_vm3, %v1209_v9, 0 }
 0x7bc   : > { %2016 = vmatpush3.bf16.msra.mxu0 %v1214_v10  ;;  %v1836_v8 = vld [vmem:[%s2648_s6] ss:$0 sm:$0xff] }
 0x7bd   : > { %2027 = vmatprep.subr.bf16.mxu0 %v2246_v1 }
 0x886   : > { %v1191_v56 = vpop.f32.mrb[28].mxu1 }
 0x887   : > { %v2013_v57 = vpop.f32.mrb[29].mxu1  ;;  %v1197_v58 = vsel %vm496_vm2, %v1191_v56, -inf }
 0x888   : > { %1198 = vmax.xlane.f32.xlu0 %v1197_v58  ;;  %v1194_v59 = vpop.f32.mrb[30].mxu1  ;;  %v1834_v57 = vld [vmem:[%s2647_s5 + $0xc] sm:$0xf] }
 0x889   : > { %v2014_v60 = vpop.f32.mrb[31].mxu1  ;;  %v1591_v58 = vsel %vm559_vm3, %v1834_v57, 0 }
 0x915   : > { %v1199_v61 = vpop.xlane.xlu0 %1198 }
 0x916   : > { %v1200_v62 = vsub.f32 %v1191_v56, %v1199_v61 }
 0x918   : > { %v1201_v63 = vmul.f32 1.442695, %v1200_v62 }
 0x91a   : > { %2158 = vpow2.f32 %v1201_v63 }
 0x924   : > { %v2159_v0 = vpop.eup %2158 }
 0x925   : > { %v1203_v2 = vsel %vm496_vm2, %v2159_v0, 0.0 }
 0x926   : > { %1204 = vadd.xlane.f32.xlu1 %v1203_v2 }
 0x9b3   : > { %v1205_v13 = vpop.xlane.xlu1 %1204 }
 0x9b4   : > { %2160 = vrcp.f32 %v1205_v13 }
 0x9be   : > { %v2161_v14 = vpop.eup %2160 }
 0x9bf   : > { %v1207_v15 = vmul.f32 %v2161_v14, %v2159_v0 }
 0x9c1   : > { %v1208_v16 = vpack.c.bf16 %v1207_v15, %v1207_v15 }
 0x9c3   : > { %2018 = vmatmul.mubr.msk.bf16.vlgmr.msra.gmra.mrb[32].mxu0 %vm496_vm2, %v1208_v16 }
 0x9c4   : > { %2031 = vmatprep.mubr.msk.bf16.mxu0 %vm2247_vm0, %v2246_v1  ;;  %2028 = vmatpush3.bf16.msra.mxu0 %v2146_v17 }
 0x9c5   : > { %2029 = vmatprep.subr.bf16.mxu0 %v2246_v1 }
 0x9c8   : > { %2030 = vmatpush3.bf16.msra.mxu0 %v2147_v18 }
 0x9c9   : > { %2043 = vmatprep.subr.bf16.mxu0 %v2246_v1 }
 0x9cb   : > { %2032 = vmatmul.mubr.msk.bf16.vlgmr.msra.gmra.mrb[36].mxu0 %vm335_vm1, %v2375_v6 }
 0x9cc   : > { %2047 = vmatprep.mubr.msk.bf16.mxu0 %vm2247_vm0, %v2246_v1  ;;  %2044 = vmatpush3.bf16.msra.mxu0 %v2148_v41 }
 0x9cd   : > { %2045 = vmatprep.subr.bf16.mxu0 %v2246_v1 }
 0x9d0   : > { %2046 = vmatpush3.bf16.msra.mxu0 %v2149_v42 }
 0x9d1   : > { %2057 = vmatprep.subr.bf16.mxu0 %v2246_v1 }
 0x9d3   : > { %2048 = vmatmul.mubr.msk.bf16.vlgmr.msra.gmra.mrb[40].mxu0 %vm335_vm1, %v2373_v5 }
 0x9d4   : > { %2059 = vmatprep.mubr.msk.bf16.mxu0 %vm2247_vm0, %v2246_v1 }
 0xa96   : > { %v1250_v19 = vpop.f32.mrb[32].mxu0 }
 0xa97   : > { %v1256_v21 = vpack.c.bf16 %v1250_v19, %v1250_v19  ;;  %v2019_v22 = vpop.f32.mrb[33].mxu0 }
 0xa98   : > { %v1253_v23 = vpop.f32.mrb[34].mxu0 }
 0xa99   : > { %v2020_v24 = vpop.f32.mrb[35].mxu0  ;;  %2024 = vmatmul.mubr.msk.bf16.vlgmr.msra.gmra.mrb[32].mxu1 %vm496_vm2, %v1256_v21 }
 0xa9a   : > { %2036 = vmatpush3.bf16.msra.mxu1 %v2144_v20  ;;  %2039 = vmatprep.mubr.msk.bf16.mxu1 %vm2247_vm0, %v2246_v1 }
 0xa9b   : > { %2037 = vmatprep.subr.bf16.mxu1 %v2246_v1 }
 0xa9e   : > { %2038 = vmatpush3.bf16.msra.mxu1 %v2145_v25  ;;  %v1357_v6 = vpop.f32.mrb[36].mxu0 }
 0xa9f   : > { %2051 = vmatprep.subr.bf16.mxu1 %v2246_v1  ;;  %v2033_v26 = vpop.f32.mrb[37].mxu0  ;;  %v1477_v40 = vpack.c.bf16 %v1357_v6, %v1357_v6 }
 0xaa0   : > { %v1360_v27 = vpop.f32.mrb[38].mxu0 }
 0xaa1   : > { %2040 = vmatmul.mubr.msk.bf16.vlgmr.msra.gmra.mrb[36].mxu1 %vm335_vm1, %v2373_v5  ;;  %v2034_v28 = vpop.f32.mrb[39].mxu0 }
 0xaa2   : > { %2053 = vmatprep.mubr.msk.bf16.mxu1 %vm2247_vm0, %v2246_v1 }
 0xaa6   : > { %v1471_v53 = vpop.f32.mrb[40].mxu0 }
 0xaa7   : > { %v2049_v5 = vpop.f32.mrb[41].mxu0 }
 0xaa8   : > { %v1474_v54 = vpop.f32.mrb[42].mxu0 }
 0xaa9   : > { %v2050_v55 = vpop.f32.mrb[43].mxu0 }
 0xb6c   : > { %v1299_v29 = vpop.f32.mrb[32].mxu1 }
 0xb6d   : > { %v2557_v30 = vadd.f32 %v1299_v29, %v2500_v45  ;;  %v2025_v31 = vpop.f32.mrb[33].mxu1 }
 0xb6e   : > { %v1302_v32 = vpop.f32.mrb[34].mxu1 }
 0xb6f   : > { %v2026_v33 = vpop.f32.mrb[35].mxu1 }
 0xb74   : > { %v1414_v34 = vpop.f32.mrb[36].mxu1 }
 0xb75   : > { %v1478_v35 = vpack.c.bf16 %v1414_v34, %v1414_v34  ;;  %v2041_v36 = vpop.f32.mrb[37].mxu1 }
 0xb76   : > { %v1417_v37 = vpop.f32.mrb[38].mxu1 }
 0xb77   : > { %v1483_v38 = vsel %vm496_vm2, %v1478_v35, 0  ;;  %v2042_v39 = vpop.f32.mrb[39].mxu1 }
 0xb78   : > { %2052 = vmatpush3.bf16.xpose.msra.mxu1 %v1483_v38 }
 0xb79   : > { %2063 = vmatprep.subr.bf16.mxu1 %v2246_v1 }
 0xb7f   : > { %2054 = vmatmul.mubr.msk.bf16.vlgmr.msra.gmra.mrb[40].mxu1 %vm496_vm2, %v1477_v40 }
 0xb80   : > { %2065 = vmatprep.mubr.msk.bf16.mxu1 %vm2247_vm0, %v2246_v1  ;;  %v1537_v1 = vpack.c.bf16 %v1471_v53, %v1471_v53  ;;  %2064 = vmatpush3.bf16.msra.mxu1 %v1591_v58 }
 0xb82   : > { %v1542_v56 = vsel %vm559_vm3, %v1537_v1, 0 }
 0xb83   : > { %2058 = vmatpush3.bf16.msra.mxu0 %v1542_v56 }
 0xc52   : > { %v1519_v43 = vpop.f32.mrb[40].mxu1 }
 0xc53   : > { %v2055_v44 = vpop.f32.mrb[41].mxu1  ;;  %v1525_v45 = vsel %vm496_vm2, %v1519_v43, -inf }
 0xc54   : > { %1526 = vmax.xlane.f32.xlu0 %v1525_v45  ;;  %v1522_v46 = vpop.f32.mrb[42].mxu1 }
 0xc55   : > { %v2056_v47 = vpop.f32.mrb[43].mxu1 }
 0xce1   : > { %v1527_v48 = vpop.xlane.xlu0 %1526 }
 0xce2   : > { %v1528_v49 = vsub.f32 %v1519_v43, %v1527_v48 }
 0xce4   : > { %v1529_v50 = vmul.f32 1.442695, %v1528_v49 }
 0xce6   : > { %2162 = vpow2.f32 %v1529_v50 }
 0xcf0   : > { %v2163_v51 = vpop.eup %2162 }
 0xcf1   : > { %v1531_v52 = vsel %vm496_vm2, %v2163_v51, 0.0 }
 0xcf2   : > { %1532 = vadd.xlane.f32.xlu1 %v1531_v52 }
 0xd7f   : > { %v1533_v59 = vpop.xlane.xlu1 %1532 }
 0xd80   : > { %2164 = vrcp.f32 %v1533_v59 }
 0xd8a   : > { %v2165_v60 = vpop.eup %2164 }
 0xd8b   : > { %v1535_v61 = vmul.f32 %v2165_v60, %v2163_v51 }
 0xd8d   : > { %v1536_v62 = vpack.c.bf16 %v1535_v61, %v1535_v61 }
 0xd8f   : > { %2060 = vmatmul.mubr.msk.bf16.vlgmr.msra.gmra.mrb[44].mxu0 %vm496_vm2, %v1536_v62 }
 0xe62   : > { %v1578_v63 = vpop.f32.mrb[44].mxu0 }
 0xe63   : > { %v1584_v0 = vpack.c.bf16 %v1578_v63, %v1578_v63  ;;  %v2061_v2 = vpop.f32.mrb[45].mxu0 }
 0xe64   : > { %v1581_v3 = vpop.f32.mrb[46].mxu0 }
 0xe65   : > { %v2062_v4 = vpop.f32.mrb[47].mxu0  ;;  %2066 = vmatmul.mubr.msk.bf16.vlgmr.msra.gmra.mrb[44].mxu1 %vm496_vm2, %v1584_v0 }
 0xf38   : > { %v1627_v7 = vpop.f32.mrb[44].mxu1 }
 0xf39   : > { %v1633_v9 = vadd.f32 %v1627_v7, %v2557_v30  ;;  %v2067_v10 = vpop.f32.mrb[45].mxu1 }
 0xf3a   : > { %v1630_v11 = vpop.f32.mrb[46].mxu1 }
 0xf3b   : > { %v1641_v12 = vadd.f32 %v1836_v8, %v1633_v9  ;;  %v2068_v13 = vpop.f32.mrb[47].mxu1 }
 0xf3d   : > { %1642 = vst.msk [vmem:[%s304_s19] sm:$0xff] %vm335_vm1, %v1641_v12 }
 0xf3e   : > { %2179 = shalt.err (!%p2176_p5)
}
 0xf3f   : > { %s2180_s12 = scalar_lea.hbm %s2594_s23, 128  ;;  %s2184_s18 = scalar_lea.hbm %s2649_s7, 256 }
 0xf40   : > { %p2181_p6 = scmp.ne.s32.totalorder %s2594_s23, %s2180_s12  ;;  %p2185_p10 = scmp.lt.u32.totalorder %s2594_s23, %s2649_s7 }
 0xf41   : > { %p2186_p11 = scmp.lt.u32.totalorder %s2184_s18, %s2180_s12  ;;  %p2188_p13 = scmp.lt.u32.totalorder %s2180_s12, %s2594_s23 }
 0xf42   : > { %p2182_p7 = pnand %p2181_p6, %p2329_p4 }
 0xf43   : > { %p2187_p12 = por %p2186_p11, %p2185_p10 }
 0xf44   : > { %p2183_p9 = pneg %p2182_p7 }
 0xf45   : > { %p2189_p0 = por %p2188_p13, %p2187_p12 }
 0xf47   : > { %p2190_p1 = pnand %p2189_p0, %p2183_p9 }
 0xf49   : > { %2193 = shalt.err (!%p2190_p1)
}
 0xf4a   : > { %2069 = dma.vmem_to_hbm [thread:$0]  (%p2329_p4), %s2596_s20, 128, %s2594_s23, %s1644_s27  }
 0xf4b PF: > { %p2075_p2 = scmp.ge.s32.totalorder %s2244_s29, 2  ;;  %s1670_s22 = sand.u32 1, %s2224_s24  }
 0xf4c   : > { %s1671_s30 = scalar_lea.sflag [#allocation3], %s1670_s22 }
 0xf4d   : > { %p2072_p3 = pnand %p2075_p2, %p2336_p8 }
 0xf4f   : > { %2219 = dma.done.wait (!%p2072_p3), %s1671_s30, 128  }
 0xf50   : > { %2221 = vsyncadd (!%p2072_p3), %s1671_s30, 4294967168  ;;  %s20_s29 = sadd.s32 1, %s2244_s29   ;;  %s2652_s24 = smov %s2228_s25 }
 0xf51   : > { %p17_p5 = scmp.ge.s32.totalorder %s20_s29, 4   ;;  %s2653_s25 = smov %s2232_s26 }
 0xf52   : > { %s2654_s26 = smov %s2342_s14  ;;  %s2655_s27 = smov %s2240_s28 }
 0xf53   : > { %s2656_s28 = smov %s2658_s9  ;;  %19 = sbr.rel (!%p17_p5) target bundleno = 4 (0x4), region = 98 }
 0xf5a   :  { %1676 = vsyncpa [#allocation3], 1 }
 0xf5b   :  { %1678 = vsyncpa [#allocation3 + $0x1], 1 }

</bundles_post_ra>
